<compile_context>
chip_gen: v6e
topology: v6e:2x2x1
jax: 0.10.0
libtpu: 0.0.40
codegen_flags: <defaults>
</compile_context>

<pallas_src>
import jax
import jax.numpy as jnp
from jax import lax
from jax.experimental import pallas as pl
from jax.experimental.pallas import tpu as pltpu

_LANE = 128


def _make_lstm_kernel(T, B, H):
    """Build the single-invocation LSTM kernel (T, B, H baked in at trace time)."""

    def lstm_kernel(xf_ref, wih_ref, whh_ref, b_ref, out_ref, gx_ref):
        # xf_ref : (T*B, D)       flattened input sequence
        # wih_ref: (D, 4*Hp)      gate-col-padded W_ih^T
        # whh_ref: (H, 4*Hp)      gate-col-padded W_hh^T (NO row padding -> K=H)
        # b_ref  : (1, 4*Hp)      gate-col-padded (b_ih + b_hh)
        # out_ref: (T, B, Hp)     h_t sequence (padded hidden)
        # gx_ref : (T*B, 4*Hp)    VMEM scratch for the hoisted input projection
        Hp = out_ref.shape[-1]

        # Hoisted input projection: one big MXU matmul + bias, written straight to
        # VMEM scratch so it never sits in vregs across the unrolled recurrence.
        gx_ref[...] = (
            jnp.dot(xf_ref[...], wih_ref[...], preferred_element_type=jnp.float32)
            + b_ref[...]
        )  # (T*B, 4*Hp)

        # Only 16 vregs after the K-unpadding -> safe to keep resident for all steps
        # (avoids re-issuing weight loads on the serial critical path).
        w_hh = whh_ref[...]  # (H, 4*Hp)

        h = jnp.zeros((B, Hp), jnp.float32)
        c = jnp.zeros((B, Hp), jnp.float32)

        # Static unroll over time (T small & known at trace time).
        for t in range(T):
            gxt = gx_ref[t * B:(t + 1) * B, :]  # 4-vreg load per step, tile-aligned
            # Recurrence matmul with unpadded contraction depth K=H; padded h lanes
            # are exactly zero, so dropping them from the LHS is bit-identical.
            gates = gxt + jnp.dot(
                h[:, :H], w_hh, preferred_element_type=jnp.float32
            )  # (B, 4*Hp)
            # Each gate band is a full 128-lane tile -> tile-aligned slices.
            i = jax.nn.sigmoid(gates[:, 0 * Hp:1 * Hp])
            f = jax.nn.sigmoid(gates[:, 1 * Hp:2 * Hp])
            g = jnp.tanh(gates[:, 2 * Hp:3 * Hp])
            o = jax.nn.sigmoid(gates[:, 3 * Hp:4 * Hp])
            c = f * c + i * g
            h = o * jnp.tanh(c)
            out_ref[t] = h.astype(out_ref.dtype)  # (B, Hp) lane-dense store

    return lstm_kernel


def lstm_forward(x, w_ih, w_hh, b):
    """x: (T, B, D); w_ih: (D, 4H); w_hh: (H, 4H); b: (1, 4H).  Returns (T, B, H)."""
    T, B, D = x.shape
    H = w_hh.shape[0]
    Hp = max(_LANE, -(-H // _LANE) * _LANE)  # pad each gate's hidden width to 128

    def pad_gate_cols(w):
        # (rows, 4H) -> (rows, 4Hp): zero-pad each gate block's hidden columns.
        rows = w.shape[0]
        return jnp.pad(
            w.reshape(rows, 4, H), ((0, 0), (0, 0), (0, Hp - H))
        ).reshape(rows, 4 * Hp)

    w_ih_p = pad_ate = pad_gate_cols(w_ih)        # (D, 4*Hp)
    w_hh_p = pad_gate_cols(w_hh)                  # (H, 4*Hp)  -- no row padding
    b_p = pad_gate_cols(b.reshape(1, 4 * H))      # (1, 4*Hp)
    x_flat = x.reshape(T * B, D)                  # flatten outside kernel

    vmem = pl.BlockSpec(memory_space=pltpu.MemorySpace.VMEM)
    out_p = pl.pallas_call(
        _make_lstm_kernel(T, B, H),
        out_shape=jax.ShapeDtypeStruct((T, B, Hp), x.dtype),
        in_specs=[vmem, vmem, vmem, vmem],
        out_specs=vmem,
        scratch_shapes=[pltpu.VMEM((T * B, 4 * Hp), jnp.float32)],
    )(x_flat, w_ih_p, w_hh_p, b_p)
    return out_p[:, :, :H]


def lstm_reference(x, w_ih, w_hh, b):
    """Pure-JAX reference matching PyTorch nn.LSTM (gate order i,f,g,o)."""
    T, B, D = x.shape
    H = w_hh.shape[0]

    def step(carry, x_t):
        h, c = carry
        gates = x_t @ w_ih + h @ w_hh + b
        i = jax.nn.sigmoid(gates[:, 0 * H:1 * H])
        f = jax.nn.sigmoid(gates[:, 1 * H:2 * H])
        g = jnp.tanh(gates[:, 2 * H:3 * H])
        o = jax.nn.sigmoid(gates[:, 3 * H:4 * H])
        c_new = f * c + i * g
        h_new = o * jnp.tanh(c_new)
        return (h_new, c_new), h_new

    h0 = jnp.zeros((B, H), jnp.float32)
    c0 = jnp.zeros((B, H), jnp.float32)
    _, hs = lax.scan(step, (h0, c0), x)
    return hs


if __name__ == "__main__":
    # Small shapes consistent with RNNfield(in_size, classes_no, time_steps=10):
    # seq_len=8, batch=8, in_size=32, hidden (classes_no)=32
    T, B, D_in, H = 8, 8, 32, 32

    key = jax.random.PRNGKey(0)
    kx, k1, k2, k3, k4 = jax.random.split(key, 5)

    scale = 1.0 / jnp.sqrt(H)
    x = jax.random.normal(kx, (T, B, D_in), dtype=jnp.float32)
    # PyTorch stores weight_ih_l0 as (4H, D); we pass its transpose for the matmul.
    w_ih = jax.random.uniform(k1, (D_in, 4 * H), jnp.float32, -scale, scale)
    w_hh = jax.random.uniform(k2, (H, 4 * H), jnp.float32, -scale, scale)
    b_ih = jax.random.uniform(k3, (4 * H,), jnp.float32, -scale, scale)
    b_hh = jax.random.uniform(k4, (4 * H,), jnp.float32, -scale, scale)
    b = (b_ih + b_hh).reshape(1, 4 * H)

    fwd = jax.jit(lstm_forward)
    out = jax.block_until_ready(fwd(x, w_ih, w_hh, b))
    ref = jax.block_until_ready(lstm_reference(x, w_ih, w_hh, b))

    assert out.shape == (T, B, H)
    assert jnp.allclose(out, ref, atol=2e-5, rtol=1e-5), "Pallas LSTM mismatch vs reference"
    print("KERNEL_OK")
</pallas_src>

<mosaic_0001>
module attributes {stable_mosaic.version = 11 : i64} {
  func.func @lstm_kernel(%arg0: memref<64x32xf32, #tpu.memory_space<vmem>>, %arg1: memref<32x512xf32, #tpu.memory_space<vmem>>, %arg2: memref<32x512xf32, #tpu.memory_space<vmem>>, %arg3: memref<1x512xf32, #tpu.memory_space<vmem>>, %arg4: memref<8x8x128xf32, #tpu.memory_space<vmem>>, %arg5: memref<64x512xf32, #tpu.memory_space<vmem>>) attributes {dimension_semantics = [], scalar_prefetch = 0 : i64, scratch_operands = 1 : i64, tpu.core_type = #tpu.core_type<tc>} {
    %c0 = arith.constant 0 : index
    %c0_0 = arith.constant 0 : index
    %0 = vector.load %arg0[%c0, %c0_0] : memref<64x32xf32, #tpu.memory_space<vmem>>, vector<64x32xf32>
    %c0_1 = arith.constant 0 : index
    %c0_2 = arith.constant 0 : index
    %1 = vector.load %arg1[%c0_1, %c0_2] : memref<32x512xf32, #tpu.memory_space<vmem>>, vector<32x512xf32>
    %cst = arith.constant dense<0.000000e+00> : vector<64x512xf32>
    %2 = tpu.matmul %0, %1, %cst {dimension_numbers = #tpu.dot_dimension_numbers<[1], [0], [0], [1], [0, 0, 1, 1], [], []>} : vector<64x32xf32>, vector<32x512xf32>, vector<64x512xf32> -> vector<64x512xf32>
    %c0_3 = arith.constant 0 : index
    %c0_4 = arith.constant 0 : index
    %3 = vector.load %arg3[%c0_3, %c0_4] : memref<1x512xf32, #tpu.memory_space<vmem>>, vector<1x512xf32>
    %4 = vector.broadcast %3 : vector<1x512xf32> to vector<64x512xf32>
    %5 = arith.addf %2, %4 : vector<64x512xf32>
    %c0_5 = arith.constant 0 : index
    %c0_6 = arith.constant 0 : index
    %6 = vector.load %arg5[%c0_5, %c0_6] : memref<64x512xf32, #tpu.memory_space<vmem>>, vector<64x512xf32>
    tpu.vector_store %arg5[%c0_5, %c0_6], %5 {strides = array<i32>} : memref<64x512xf32, #tpu.memory_space<vmem>>, vector<64x512xf32>,
    %c0_7 = arith.constant 0 : index
    %c0_8 = arith.constant 0 : index
    %7 = vector.load %arg2[%c0_7, %c0_8] : memref<32x512xf32, #tpu.memory_space<vmem>>, vector<32x512xf32>
    %cst_9 = arith.constant 0.000000e+00 : f32
    %8 = vector.broadcast %cst_9 : f32 to vector<8x128xf32>
    %cst_10 = arith.constant 0.000000e+00 : f32
    %9 = vector.broadcast %cst_10 : f32 to vector<8x128xf32>
    %c0_11 = arith.constant 0 : index
    %c0_12 = arith.constant 0 : index
    %10 = vector.load %arg5[%c0_11, %c0_12] : memref<64x512xf32, #tpu.memory_space<vmem>>, vector<8x512xf32>
    %11 = vector.extract_strided_slice %8 {offsets = [0, 0], sizes = [8, 32], strides = [1, 1]} : vector<8x128xf32> to vector<8x32xf32>
    %cst_13 = arith.constant dense<0.000000e+00> : vector<8x512xf32>
    %12 = tpu.matmul %11, %7, %cst_13 {dimension_numbers = #tpu.dot_dimension_numbers<[1], [0], [0], [1], [0, 0, 1, 1], [], []>} : vector<8x32xf32>, vector<32x512xf32>, vector<8x512xf32> -> vector<8x512xf32>
    %13 = arith.addf %10, %12 : vector<8x512xf32>
    %14 = vector.extract_strided_slice %13 {offsets = [0, 0], sizes = [8, 128], strides = [1, 1]} : vector<8x512xf32> to vector<8x128xf32>
    %15 = arith.negf %14 : vector<8x128xf32>
    %16 = math.exp %15 : vector<8x128xf32>
    %cst_14 = arith.constant 1.000000e+00 : f32
    %17 = vector.broadcast %cst_14 : f32 to vector<8x128xf32>
    %18 = arith.addf %17, %16 : vector<8x128xf32>
    %19 = arith.divf %17, %18 : vector<8x128xf32>
    %20 = vector.extract_strided_slice %13 {offsets = [0, 128], sizes = [8, 128], strides = [1, 1]} : vector<8x512xf32> to vector<8x128xf32>
    %21 = arith.negf %20 : vector<8x128xf32>
    %22 = math.exp %21 : vector<8x128xf32>
    %cst_15 = arith.constant 1.000000e+00 : f32
    %23 = vector.broadcast %cst_15 : f32 to vector<8x128xf32>
    %24 = arith.addf %23, %22 : vector<8x128xf32>
    %25 = arith.divf %23, %24 : vector<8x128xf32>
    %26 = vector.extract_strided_slice %13 {offsets = [0, 256], sizes = [8, 128], strides = [1, 1]} : vector<8x512xf32> to vector<8x128xf32>
    %27 = math.tanh %26 : vector<8x128xf32>
    %28 = vector.extract_strided_slice %13 {offsets = [0, 384], sizes = [8, 128], strides = [1, 1]} : vector<8x512xf32> to vector<8x128xf32>
    %29 = arith.negf %28 : vector<8x128xf32>
    %30 = math.exp %29 : vector<8x128xf32>
    %cst_16 = arith.constant 1.000000e+00 : f32
    %31 = vector.broadcast %cst_16 : f32 to vector<8x128xf32>
    %32 = arith.addf %31, %30 : vector<8x128xf32>
    %33 = arith.divf %31, %32 : vector<8x128xf32>
    %34 = arith.mulf %25, %9 : vector<8x128xf32>
    %35 = arith.mulf %19, %27 : vector<8x128xf32>
    %36 = arith.addf %34, %35 : vector<8x128xf32>
    %37 = math.tanh %36 : vector<8x128xf32>
    %38 = arith.mulf %33, %37 : vector<8x128xf32>
    %c0_17 = arith.constant 0 : index
    %c0_18 = arith.constant 0 : index
    %c0_19 = arith.constant 0 : index
    %39 = vector.load %arg4[%c0_17, %c0_18, %c0_19] : memref<8x8x128xf32, #tpu.memory_space<vmem>>, vector<1x8x128xf32>
    %40 = vector.shape_cast %39 : vector<1x8x128xf32> to vector<8x128xf32>
    %41 = vector.shape_cast %38 : vector<8x128xf32> to vector<1x8x128xf32>
    tpu.vector_store %arg4[%c0_17, %c0_18, %c0_19], %41 {strides = array<i32>} : memref<8x8x128xf32, #tpu.memory_space<vmem>>, vector<1x8x128xf32>,
    %c8 = arith.constant 8 : index
    %c0_20 = arith.constant 0 : index
    %42 = vector.load %arg5[%c8, %c0_20] : memref<64x512xf32, #tpu.memory_space<vmem>>, vector<8x512xf32>
    %43 = vector.extract_strided_slice %38 {offsets = [0, 0], sizes = [8, 32], strides = [1, 1]} : vector<8x128xf32> to vector<8x32xf32>
    %cst_21 = arith.constant dense<0.000000e+00> : vector<8x512xf32>
    %44 = tpu.matmul %43, %7, %cst_21 {dimension_numbers = #tpu.dot_dimension_numbers<[1], [0], [0], [1], [0, 0, 1, 1], [], []>} : vector<8x32xf32>, vector<32x512xf32>, vector<8x512xf32> -> vector<8x512xf32>
    %45 = arith.addf %42, %44 : vector<8x512xf32>
    %46 = vector.extract_strided_slice %45 {offsets = [0, 0], sizes = [8, 128], strides = [1, 1]} : vector<8x512xf32> to vector<8x128xf32>
    %47 = arith.negf %46 : vector<8x128xf32>
    %48 = math.exp %47 : vector<8x128xf32>
    %cst_22 = arith.constant 1.000000e+00 : f32
    %49 = vector.broadcast %cst_22 : f32 to vector<8x128xf32>
    %50 = arith.addf %49, %48 : vector<8x128xf32>
    %51 = arith.divf %49, %50 : vector<8x128xf32>
    %52 = vector.extract_strided_slice %45 {offsets = [0, 128], sizes = [8, 128], strides = [1, 1]} : vector<8x512xf32> to vector<8x128xf32>
    %53 = arith.negf %52 : vector<8x128xf32>
    %54 = math.exp %53 : vector<8x128xf32>
    %cst_23 = arith.constant 1.000000e+00 : f32
    %55 = vector.broadcast %cst_23 : f32 to vector<8x128xf32>
    %56 = arith.addf %55, %54 : vector<8x128xf32>
    %57 = arith.divf %55, %56 : vector<8x128xf32>
    %58 = vector.extract_strided_slice %45 {offsets = [0, 256], sizes = [8, 128], strides = [1, 1]} : vector<8x512xf32> to vector<8x128xf32>
    %59 = math.tanh %58 : vector<8x128xf32>
    %60 = vector.extract_strided_slice %45 {offsets = [0, 384], sizes = [8, 128], strides = [1, 1]} : vector<8x512xf32> to vector<8x128xf32>
    %61 = arith.negf %60 : vector<8x128xf32>
    %62 = math.exp %61 : vector<8x128xf32>
    %cst_24 = arith.constant 1.000000e+00 : f32
    %63 = vector.broadcast %cst_24 : f32 to vector<8x128xf32>
    %64 = arith.addf %63, %62 : vector<8x128xf32>
    %65 = arith.divf %63, %64 : vector<8x128xf32>
    %66 = arith.mulf %57, %36 : vector<8x128xf32>
    %67 = arith.mulf %51, %59 : vector<8x128xf32>
    %68 = arith.addf %66, %67 : vector<8x128xf32>
    %69 = math.tanh %68 : vector<8x128xf32>
    %70 = arith.mulf %65, %69 : vector<8x128xf32>
    %c1 = arith.constant 1 : index
    %c0_25 = arith.constant 0 : index
    %c0_26 = arith.constant 0 : index
    %71 = vector.load %arg4[%c1, %c0_25, %c0_26] : memref<8x8x128xf32, #tpu.memory_space<vmem>>, vector<1x8x128xf32>
    %72 = vector.shape_cast %71 : vector<1x8x128xf32> to vector<8x128xf32>
    %73 = vector.shape_cast %70 : vector<8x128xf32> to vector<1x8x128xf32>
    tpu.vector_store %arg4[%c1, %c0_25, %c0_26], %73 {strides = array<i32>} : memref<8x8x128xf32, #tpu.memory_space<vmem>>, vector<1x8x128xf32>,
    %c16 = arith.constant 16 : index
    %c0_27 = arith.constant 0 : index
    %74 = vector.load %arg5[%c16, %c0_27] : memref<64x512xf32, #tpu.memory_space<vmem>>, vector<8x512xf32>
    %75 = vector.extract_strided_slice %70 {offsets = [0, 0], sizes = [8, 32], strides = [1, 1]} : vector<8x128xf32> to vector<8x32xf32>
    %cst_28 = arith.constant dense<0.000000e+00> : vector<8x512xf32>
    %76 = tpu.matmul %75, %7, %cst_28 {dimension_numbers = #tpu.dot_dimension_numbers<[1], [0], [0], [1], [0, 0, 1, 1], [], []>} : vector<8x32xf32>, vector<32x512xf32>, vector<8x512xf32> -> vector<8x512xf32>
    %77 = arith.addf %74, %76 : vector<8x512xf32>
    %78 = vector.extract_strided_slice %77 {offsets = [0, 0], sizes = [8, 128], strides = [1, 1]} : vector<8x512xf32> to vector<8x128xf32>
    %79 = arith.negf %78 : vector<8x128xf32>
    %80 = math.exp %79 : vector<8x128xf32>
    %cst_29 = arith.constant 1.000000e+00 : f32
    %81 = vector.broadcast %cst_29 : f32 to vector<8x128xf32>
    %82 = arith.addf %81, %80 : vector<8x128xf32>
    %83 = arith.divf %81, %82 : vector<8x128xf32>
    %84 = vector.extract_strided_slice %77 {offsets = [0, 128], sizes = [8, 128], strides = [1, 1]} : vector<8x512xf32> to vector<8x128xf32>
    %85 = arith.negf %84 : vector<8x128xf32>
    %86 = math.exp %85 : vector<8x128xf32>
    %cst_30 = arith.constant 1.000000e+00 : f32
    %87 = vector.broadcast %cst_30 : f32 to vector<8x128xf32>
    %88 = arith.addf %87, %86 : vector<8x128xf32>
    %89 = arith.divf %87, %88 : vector<8x128xf32>
    %90 = vector.extract_strided_slice %77 {offsets = [0, 256], sizes = [8, 128], strides = [1, 1]} : vector<8x512xf32> to vector<8x128xf32>
    %91 = math.tanh %90 : vector<8x128xf32>
    %92 = vector.extract_strided_slice %77 {offsets = [0, 384], sizes = [8, 128], strides = [1, 1]} : vector<8x512xf32> to vector<8x128xf32>
    %93 = arith.negf %92 : vector<8x128xf32>
    %94 = math.exp %93 : vector<8x128xf32>
    %cst_31 = arith.constant 1.000000e+00 : f32
    %95 = vector.broadcast %cst_31 : f32 to vector<8x128xf32>
    %96 = arith.addf %95, %94 : vector<8x128xf32>
    %97 = arith.divf %95, %96 : vector<8x128xf32>
    %98 = arith.mulf %89, %68 : vector<8x128xf32>
    %99 = arith.mulf %83, %91 : vector<8x128xf32>
    %100 = arith.addf %98, %99 : vector<8x128xf32>
    %101 = math.tanh %100 : vector<8x128xf32>
    %102 = arith.mulf %97, %101 : vector<8x128xf32>
    %c2 = arith.constant 2 : index
    %c0_32 = arith.constant 0 : index
    %c0_33 = arith.constant 0 : index
    %103 = vector.load %arg4[%c2, %c0_32, %c0_33] : memref<8x8x128xf32, #tpu.memory_space<vmem>>, vector<1x8x128xf32>
    %104 = vector.shape_cast %103 : vector<1x8x128xf32> to vector<8x128xf32>
    %105 = vector.shape_cast %102 : vector<8x128xf32> to vector<1x8x128xf32>
    tpu.vector_store %arg4[%c2, %c0_32, %c0_33], %105 {strides = array<i32>} : memref<8x8x128xf32, #tpu.memory_space<vmem>>, vector<1x8x128xf32>,
    %c24 = arith.constant 24 : index
    %c0_34 = arith.constant 0 : index
    %106 = vector.load %arg5[%c24, %c0_34] : memref<64x512xf32, #tpu.memory_space<vmem>>, vector<8x512xf32>
    %107 = vector.extract_strided_slice %102 {offsets = [0, 0], sizes = [8, 32], strides = [1, 1]} : vector<8x128xf32> to vector<8x32xf32>
    %cst_35 = arith.constant dense<0.000000e+00> : vector<8x512xf32>
    %108 = tpu.matmul %107, %7, %cst_35 {dimension_numbers = #tpu.dot_dimension_numbers<[1], [0], [0], [1], [0, 0, 1, 1], [], []>} : vector<8x32xf32>, vector<32x512xf32>, vector<8x512xf32> -> vector<8x512xf32>
    %109 = arith.addf %106, %108 : vector<8x512xf32>
    %110 = vector.extract_strided_slice %109 {offsets = [0, 0], sizes = [8, 128], strides = [1, 1]} : vector<8x512xf32> to vector<8x128xf32>
    %111 = arith.negf %110 : vector<8x128xf32>
    %112 = math.exp %111 : vector<8x128xf32>
    %cst_36 = arith.constant 1.000000e+00 : f32
    %113 = vector.broadcast %cst_36 : f32 to vector<8x128xf32>
    %114 = arith.addf %113, %112 : vector<8x128xf32>
    %115 = arith.divf %113, %114 : vector<8x128xf32>
    %116 = vector.extract_strided_slice %109 {offsets = [0, 128], sizes = [8, 128], strides = [1, 1]} : vector<8x512xf32> to vector<8x128xf32>
    %117 = arith.negf %116 : vector<8x128xf32>
    %118 = math.exp %117 : vector<8x128xf32>
    %cst_37 = arith.constant 1.000000e+00 : f32
    %119 = vector.broadcast %cst_37 : f32 to vector<8x128xf32>
    %120 = arith.addf %119, %118 : vector<8x128xf32>
    %121 = arith.divf %119, %120 : vector<8x128xf32>
    %122 = vector.extract_strided_slice %109 {offsets = [0, 256], sizes = [8, 128], strides = [1, 1]} : vector<8x512xf32> to vector<8x128xf32>
    %123 = math.tanh %122 : vector<8x128xf32>
    %124 = vector.extract_strided_slice %109 {offsets = [0, 384], sizes = [8, 128], strides = [1, 1]} : vector<8x512xf32> to vector<8x128xf32>
    %125 = arith.negf %124 : vector<8x128xf32>
    %126 = math.exp %125 : vector<8x128xf32>
    %cst_38 = arith.constant 1.000000e+00 : f32
    %127 = vector.broadcast %cst_38 : f32 to vector<8x128xf32>
    %128 = arith.addf %127, %126 : vector<8x128xf32>
    %129 = arith.divf %127, %128 : vector<8x128xf32>
    %130 = arith.mulf %121, %100 : vector<8x128xf32>
    %131 = arith.mulf %115, %123 : vector<8x128xf32>
    %132 = arith.addf %130, %131 : vector<8x128xf32>
    %133 = math.tanh %132 : vector<8x128xf32>
    %134 = arith.mulf %129, %133 : vector<8x128xf32>
    %c3 = arith.constant 3 : index
    %c0_39 = arith.constant 0 : index
    %c0_40 = arith.constant 0 : index
    %135 = vector.load %arg4[%c3, %c0_39, %c0_40] : memref<8x8x128xf32, #tpu.memory_space<vmem>>, vector<1x8x128xf32>
    %136 = vector.shape_cast %135 : vector<1x8x128xf32> to vector<8x128xf32>
    %137 = vector.shape_cast %134 : vector<8x128xf32> to vector<1x8x128xf32>
    tpu.vector_store %arg4[%c3, %c0_39, %c0_40], %137 {strides = array<i32>} : memref<8x8x128xf32, #tpu.memory_space<vmem>>, vector<1x8x128xf32>,
    %c32 = arith.constant 32 : index
    %c0_41 = arith.constant 0 : index
    %138 = vector.load %arg5[%c32, %c0_41] : memref<64x512xf32, #tpu.memory_space<vmem>>, vector<8x512xf32>
    %139 = vector.extract_strided_slice %134 {offsets = [0, 0], sizes = [8, 32], strides = [1, 1]} : vector<8x128xf32> to vector<8x32xf32>
    %cst_42 = arith.constant dense<0.000000e+00> : vector<8x512xf32>
    %140 = tpu.matmul %139, %7, %cst_42 {dimension_numbers = #tpu.dot_dimension_numbers<[1], [0], [0], [1], [0, 0, 1, 1], [], []>} : vector<8x32xf32>, vector<32x512xf32>, vector<8x512xf32> -> vector<8x512xf32>
    %141 = arith.addf %138, %140 : vector<8x512xf32>
    %142 = vector.extract_strided_slice %141 {offsets = [0, 0], sizes = [8, 128], strides = [1, 1]} : vector<8x512xf32> to vector<8x128xf32>
    %143 = arith.negf %142 : vector<8x128xf32>
    %144 = math.exp %143 : vector<8x128xf32>
    %cst_43 = arith.constant 1.000000e+00 : f32
    %145 = vector.broadcast %cst_43 : f32 to vector<8x128xf32>
    %146 = arith.addf %145, %144 : vector<8x128xf32>
    %147 = arith.divf %145, %146 : vector<8x128xf32>
    %148 = vector.extract_strided_slice %141 {offsets = [0, 128], sizes = [8, 128], strides = [1, 1]} : vector<8x512xf32> to vector<8x128xf32>
    %149 = arith.negf %148 : vector<8x128xf32>
    %150 = math.exp %149 : vector<8x128xf32>
    %cst_44 = arith.constant 1.000000e+00 : f32
    %151 = vector.broadcast %cst_44 : f32 to vector<8x128xf32>
    %152 = arith.addf %151, %150 : vector<8x128xf32>
    %153 = arith.divf %151, %152 : vector<8x128xf32>
    %154 = vector.extract_strided_slice %141 {offsets = [0, 256], sizes = [8, 128], strides = [1, 1]} : vector<8x512xf32> to vector<8x128xf32>
    %155 = math.tanh %154 : vector<8x128xf32>
    %156 = vector.extract_strided_slice %141 {offsets = [0, 384], sizes = [8, 128], strides = [1, 1]} : vector<8x512xf32> to vector<8x128xf32>
    %157 = arith.negf %156 : vector<8x128xf32>
    %158 = math.exp %157 : vector<8x128xf32>
    %cst_45 = arith.constant 1.000000e+00 : f32
    %159 = vector.broadcast %cst_45 : f32 to vector<8x128xf32>
    %160 = arith.addf %159, %158 : vector<8x128xf32>
    %161 = arith.divf %159, %160 : vector<8x128xf32>
    %162 = arith.mulf %153, %132 : vector<8x128xf32>
    %163 = arith.mulf %147, %155 : vector<8x128xf32>
    %164 = arith.addf %162, %163 : vector<8x128xf32>
    %165 = math.tanh %164 : vector<8x128xf32>
    %166 = arith.mulf %161, %165 : vector<8x128xf32>
    %c4 = arith.constant 4 : index
    %c0_46 = arith.constant 0 : index
    %c0_47 = arith.constant 0 : index
    %167 = vector.load %arg4[%c4, %c0_46, %c0_47] : memref<8x8x128xf32, #tpu.memory_space<vmem>>, vector<1x8x128xf32>
    %168 = vector.shape_cast %167 : vector<1x8x128xf32> to vector<8x128xf32>
    %169 = vector.shape_cast %166 : vector<8x128xf32> to vector<1x8x128xf32>
    tpu.vector_store %arg4[%c4, %c0_46, %c0_47], %169 {strides = array<i32>} : memref<8x8x128xf32, #tpu.memory_space<vmem>>, vector<1x8x128xf32>,
    %c40 = arith.constant 40 : index
    %c0_48 = arith.constant 0 : index
    %170 = vector.load %arg5[%c40, %c0_48] : memref<64x512xf32, #tpu.memory_space<vmem>>, vector<8x512xf32>
    %171 = vector.extract_strided_slice %166 {offsets = [0, 0], sizes = [8, 32], strides = [1, 1]} : vector<8x128xf32> to vector<8x32xf32>
    %cst_49 = arith.constant dense<0.000000e+00> : vector<8x512xf32>
    %172 = tpu.matmul %171, %7, %cst_49 {dimension_numbers = #tpu.dot_dimension_numbers<[1], [0], [0], [1], [0, 0, 1, 1], [], []>} : vector<8x32xf32>, vector<32x512xf32>, vector<8x512xf32> -> vector<8x512xf32>
    %173 = arith.addf %170, %172 : vector<8x512xf32>
    %174 = vector.extract_strided_slice %173 {offsets = [0, 0], sizes = [8, 128], strides = [1, 1]} : vector<8x512xf32> to vector<8x128xf32>
    %175 = arith.negf %174 : vector<8x128xf32>
    %176 = math.exp %175 : vector<8x128xf32>
    %cst_50 = arith.constant 1.000000e+00 : f32
    %177 = vector.broadcast %cst_50 : f32 to vector<8x128xf32>
    %178 = arith.addf %177, %176 : vector<8x128xf32>
    %179 = arith.divf %177, %178 : vector<8x128xf32>
    %180 = vector.extract_strided_slice %173 {offsets = [0, 128], sizes = [8, 128], strides = [1, 1]} : vector<8x512xf32> to vector<8x128xf32>
    %181 = arith.negf %180 : vector<8x128xf32>
    %182 = math.exp %181 : vector<8x128xf32>
    %cst_51 = arith.constant 1.000000e+00 : f32
    %183 = vector.broadcast %cst_51 : f32 to vector<8x128xf32>
    %184 = arith.addf %183, %182 : vector<8x128xf32>
    %185 = arith.divf %183, %184 : vector<8x128xf32>
    %186 = vector.extract_strided_slice %173 {offsets = [0, 256], sizes = [8, 128], strides = [1, 1]} : vector<8x512xf32> to vector<8x128xf32>
    %187 = math.tanh %186 : vector<8x128xf32>
    %188 = vector.extract_strided_slice %173 {offsets = [0, 384], sizes = [8, 128], strides = [1, 1]} : vector<8x512xf32> to vector<8x128xf32>
    %189 = arith.negf %188 : vector<8x128xf32>
    %190 = math.exp %189 : vector<8x128xf32>
    %cst_52 = arith.constant 1.000000e+00 : f32
    %191 = vector.broadcast %cst_52 : f32 to vector<8x128xf32>
    %192 = arith.addf %191, %190 : vector<8x128xf32>
    %193 = arith.divf %191, %192 : vector<8x128xf32>
    %194 = arith.mulf %185, %164 : vector<8x128xf32>
    %195 = arith.mulf %179, %187 : vector<8x128xf32>
    %196 = arith.addf %194, %195 : vector<8x128xf32>
    %197 = math.tanh %196 : vector<8x128xf32>
    %198 = arith.mulf %193, %197 : vector<8x128xf32>
    %c5 = arith.constant 5 : index
    %c0_53 = arith.constant 0 : index
    %c0_54 = arith.constant 0 : index
    %199 = vector.load %arg4[%c5, %c0_53, %c0_54] : memref<8x8x128xf32, #tpu.memory_space<vmem>>, vector<1x8x128xf32>
    %200 = vector.shape_cast %199 : vector<1x8x128xf32> to vector<8x128xf32>
    %201 = vector.shape_cast %198 : vector<8x128xf32> to vector<1x8x128xf32>
    tpu.vector_store %arg4[%c5, %c0_53, %c0_54], %201 {strides = array<i32>} : memref<8x8x128xf32, #tpu.memory_space<vmem>>, vector<1x8x128xf32>,
    %c48 = arith.constant 48 : index
    %c0_55 = arith.constant 0 : index
    %202 = vector.load %arg5[%c48, %c0_55] : memref<64x512xf32, #tpu.memory_space<vmem>>, vector<8x512xf32>
    %203 = vector.extract_strided_slice %198 {offsets = [0, 0], sizes = [8, 32], strides = [1, 1]} : vector<8x128xf32> to vector<8x32xf32>
    %cst_56 = arith.constant dense<0.000000e+00> : vector<8x512xf32>
    %204 = tpu.matmul %203, %7, %cst_56 {dimension_numbers = #tpu.dot_dimension_numbers<[1], [0], [0], [1], [0, 0, 1, 1], [], []>} : vector<8x32xf32>, vector<32x512xf32>, vector<8x512xf32> -> vector<8x512xf32>
    %205 = arith.addf %202, %204 : vector<8x512xf32>
    %206 = vector.extract_strided_slice %205 {offsets = [0, 0], sizes = [8, 128], strides = [1, 1]} : vector<8x512xf32> to vector<8x128xf32>
    %207 = arith.negf %206 : vector<8x128xf32>
    %208 = math.exp %207 : vector<8x128xf32>
    %cst_57 = arith.constant 1.000000e+00 : f32
    %209 = vector.broadcast %cst_57 : f32 to vector<8x128xf32>
    %210 = arith.addf %209, %208 : vector<8x128xf32>
    %211 = arith.divf %209, %210 : vector<8x128xf32>
    %212 = vector.extract_strided_slice %205 {offsets = [0, 128], sizes = [8, 128], strides = [1, 1]} : vector<8x512xf32> to vector<8x128xf32>
    %213 = arith.negf %212 : vector<8x128xf32>
    %214 = math.exp %213 : vector<8x128xf32>
    %cst_58 = arith.constant 1.000000e+00 : f32
    %215 = vector.broadcast %cst_58 : f32 to vector<8x128xf32>
    %216 = arith.addf %215, %214 : vector<8x128xf32>
    %217 = arith.divf %215, %216 : vector<8x128xf32>
    %218 = vector.extract_strided_slice %205 {offsets = [0, 256], sizes = [8, 128], strides = [1, 1]} : vector<8x512xf32> to vector<8x128xf32>
    %219 = math.tanh %218 : vector<8x128xf32>
    %220 = vector.extract_strided_slice %205 {offsets = [0, 384], sizes = [8, 128], strides = [1, 1]} : vector<8x512xf32> to vector<8x128xf32>
    %221 = arith.negf %220 : vector<8x128xf32>
    %222 = math.exp %221 : vector<8x128xf32>
    %cst_59 = arith.constant 1.000000e+00 : f32
    %223 = vector.broadcast %cst_59 : f32 to vector<8x128xf32>
    %224 = arith.addf %223, %222 : vector<8x128xf32>
    %225 = arith.divf %223, %224 : vector<8x128xf32>
    %226 = arith.mulf %217, %196 : vector<8x128xf32>
    %227 = arith.mulf %211, %219 : vector<8x128xf32>
    %228 = arith.addf %226, %227 : vector<8x128xf32>
    %229 = math.tanh %228 : vector<8x128xf32>
    %230 = arith.mulf %225, %229 : vector<8x128xf32>
    %c6 = arith.constant 6 : index
    %c0_60 = arith.constant 0 : index
    %c0_61 = arith.constant 0 : index
    %231 = vector.load %arg4[%c6, %c0_60, %c0_61] : memref<8x8x128xf32, #tpu.memory_space<vmem>>, vector<1x8x128xf32>
    %232 = vector.shape_cast %231 : vector<1x8x128xf32> to vector<8x128xf32>
    %233 = vector.shape_cast %230 : vector<8x128xf32> to vector<1x8x128xf32>
    tpu.vector_store %arg4[%c6, %c0_60, %c0_61], %233 {strides = array<i32>} : memref<8x8x128xf32, #tpu.memory_space<vmem>>, vector<1x8x128xf32>,
    %c56 = arith.constant 56 : index
    %c0_62 = arith.constant 0 : index
    %234 = vector.load %arg5[%c56, %c0_62] : memref<64x512xf32, #tpu.memory_space<vmem>>, vector<8x512xf32>
    %235 = vector.extract_strided_slice %230 {offsets = [0, 0], sizes = [8, 32], strides = [1, 1]} : vector<8x128xf32> to vector<8x32xf32>
    %cst_63 = arith.constant dense<0.000000e+00> : vector<8x512xf32>
    %236 = tpu.matmul %235, %7, %cst_63 {dimension_numbers = #tpu.dot_dimension_numbers<[1], [0], [0], [1], [0, 0, 1, 1], [], []>} : vector<8x32xf32>, vector<32x512xf32>, vector<8x512xf32> -> vector<8x512xf32>
    %237 = arith.addf %234, %236 : vector<8x512xf32>
    %238 = vector.extract_strided_slice %237 {offsets = [0, 0], sizes = [8, 128], strides = [1, 1]} : vector<8x512xf32> to vector<8x128xf32>
    %239 = arith.negf %238 : vector<8x128xf32>
    %240 = math.exp %239 : vector<8x128xf32>
    %cst_64 = arith.constant 1.000000e+00 : f32
    %241 = vector.broadcast %cst_64 : f32 to vector<8x128xf32>
    %242 = arith.addf %241, %240 : vector<8x128xf32>
    %243 = arith.divf %241, %242 : vector<8x128xf32>
    %244 = vector.extract_strided_slice %237 {offsets = [0, 128], sizes = [8, 128], strides = [1, 1]} : vector<8x512xf32> to vector<8x128xf32>
    %245 = arith.negf %244 : vector<8x128xf32>
    %246 = math.exp %245 : vector<8x128xf32>
    %cst_65 = arith.constant 1.000000e+00 : f32
    %247 = vector.broadcast %cst_65 : f32 to vector<8x128xf32>
    %248 = arith.addf %247, %246 : vector<8x128xf32>
    %249 = arith.divf %247, %248 : vector<8x128xf32>
    %250 = vector.extract_strided_slice %237 {offsets = [0, 256], sizes = [8, 128], strides = [1, 1]} : vector<8x512xf32> to vector<8x128xf32>
    %251 = math.tanh %250 : vector<8x128xf32>
    %252 = vector.extract_strided_slice %237 {offsets = [0, 384], sizes = [8, 128], strides = [1, 1]} : vector<8x512xf32> to vector<8x128xf32>
    %253 = arith.negf %252 : vector<8x128xf32>
    %254 = math.exp %253 : vector<8x128xf32>
    %cst_66 = arith.constant 1.000000e+00 : f32
    %255 = vector.broadcast %cst_66 : f32 to vector<8x128xf32>
    %256 = arith.addf %255, %254 : vector<8x128xf32>
    %257 = arith.divf %255, %256 : vector<8x128xf32>
    %258 = arith.mulf %249, %228 : vector<8x128xf32>
    %259 = arith.mulf %243, %251 : vector<8x128xf32>
    %260 = arith.addf %258, %259 : vector<8x128xf32>
    %261 = math.tanh %260 : vector<8x128xf32>
    %262 = arith.mulf %257, %261 : vector<8x128xf32>
    %c7 = arith.constant 7 : index
    %c0_67 = arith.constant 0 : index
    %c0_68 = arith.constant 0 : index
    %263 = vector.load %arg4[%c7, %c0_67, %c0_68] : memref<8x8x128xf32, #tpu.memory_space<vmem>>, vector<1x8x128xf32>
    %264 = vector.shape_cast %263 : vector<1x8x128xf32> to vector<8x128xf32>
    %265 = vector.shape_cast %262 : vector<8x128xf32> to vector<1x8x128xf32>
    tpu.vector_store %arg4[%c7, %c0_67, %c0_68], %265 {strides = array<i32>} : memref<8x8x128xf32, #tpu.memory_space<vmem>>, vector<1x8x128xf32>,
    return
  }
}

</mosaic_0001>

<bundles_post_ra>
// kernel: lstm_forward.1
= control target key start
LH: loop header
LB: loop body
LE: loop exit
PB: predicated region body
PF: predicated region fallthrough
CT: control target
= control target key end

     0   :  { %vm64_vm0 = vcmask 261120   ;;  %v2518_v17 = vmov 0.0   ;;  %s2513_s0 = inlined_call_operand.vmem [shape: f32[64,32], index: 0, kind: input, shape index: {}]   ;;  %s2514_s1 = inlined_call_operand.vmem [shape: f32[32,512], index: 1, kind: input, shape index: {}]   ;;  %s2515_s2 = inlined_call_operand.vmem [shape: f32[32,512], index: 2, kind: input, shape index: {}]   ;;  %s2516_s3 = inlined_call_operand.vmem [shape: f32[1,512], index: 3, kind: input, shape index: {}]   ;;  %s2517_s4 = inlined_call_operand.hbm [shape: f32[8,8,128], index: 4, kind: output, shape index: {}]  }
   0x1   :  { %v39_v0 = vld [vmem:[%s2514_s1 + $0x68] sm:$0xff]  ;;  %v41_v1 = vld [vmem:[%s2514_s1 + $0x78] sm:$0xff]  ;;  %v38_v2 = vld [vmem:[%s2514_s1 + $0x60] sm:$0xff]  ;;  %153 = vmatprep.mubr.f32.mxu0 %v2518_v17  ;;  %266 = vmatprep.mubr.f32.mxu1 %v2518_v17 }
   0x2   :  { %113 = vmatprep.subr.mxu0 %v39_v0  ;;  %226 = vmatprep.subr.mxu1 %v41_v1  ;;  %v40_v3 = vld [vmem:[%s2514_s1 + $0x70] sm:$0xff]  ;;  %v35_v4 = vld [vmem:[%s2514_s1 + $0x48] sm:$0xff]  ;;  %v37_v5 = vld [vmem:[%s2514_s1 + $0x58] sm:$0xff] }
   0x3   :  { %114 = vmatpush1.msra.mxu0 %v38_v2  ;;  %227 = vmatpush1.msra.mxu1 %v40_v3  ;;  %v34_v6 = vld [vmem:[%s2514_s1 + $0x40] sm:$0xff]  ;;  %v36_v7 = vld [vmem:[%s2514_s1 + $0x50] sm:$0xff]  ;;  %v31_v8 = vld [vmem:[%s2514_s1 + $0x28] sm:$0xff] }
   0x4   :  { %115 = vmatprep.subr.mxu0 %v35_v4  ;;  %228 = vmatprep.subr.mxu1 %v37_v5  ;;  %v33_v9 = vld [vmem:[%s2514_s1 + $0x38] sm:$0xff]  ;;  %v30_v10 = vld [vmem:[%s2514_s1 + $0x20] sm:$0xff]  ;;  %v32_v11 = vld [vmem:[%s2514_s1 + $0x30] sm:$0xff] }
   0x5   :  { %116 = vmatpush1.msra.mxu0 %v34_v6  ;;  %229 = vmatpush1.msra.mxu1 %v36_v7  ;;  %v27_v12 = vld [vmem:[%s2514_s1 + $0x8] sm:$0xff]  ;;  %v29_v13 = vld [vmem:[%s2514_s1 + $0x18] sm:$0xff]  ;;  %v26_v14 = vld [vmem:[%s2514_s1] sm:$0xff] }
   0x6   :  { %117 = vmatprep.subr.mxu0 %v31_v8  ;;  %230 = vmatprep.subr.mxu1 %v33_v9  ;;  %v28_v15 = vld [vmem:[%s2514_s1 + $0x10] sm:$0xff]  ;;  %v18_v16 = vld [vmem:[%s2513_s0] sm:$0xff]  ;;  %v2102_v18 = vld [vmem:[%s2515_s2 + $0x68] sm:$0xff] }
   0x7   :  { %118 = vmatpush1.msra.mxu0 %v30_v10  ;;  %231 = vmatpush1.msra.mxu1 %v32_v11  ;;  %v2108_v19 = vld [vmem:[%s2515_s2 + $0x60] sm:$0xff]  ;;  %v2115_v20 = vld [vmem:[%s2515_s2 + $0x48] sm:$0xff]  ;;  %v2120_v21 = vld [vmem:[%s2515_s2 + $0x78] sm:$0xff] }
   0x8   :  { %119 = vmatprep.subr.mxu0 %v27_v12  ;;  %232 = vmatprep.subr.mxu1 %v29_v13  ;;  %v19_v22 = vld [vmem:[%s2513_s0 + $0x8] sm:$0xff]  ;;  %v2133_v23 = vld [vmem:[%s2515_s2 + $0x40] sm:$0xff]  ;;  %v2139_v24 = vld [vmem:[%s2515_s2 + $0x70] sm:$0xff] }
   0x9   :  { %120 = vmatpush1.msra.mxu0 %v26_v14  ;;  %233 = vmatpush1.msra.mxu1 %v28_v15 }
   0xa   :  { %1810 = vmatmul.mubr.msk.f32.vlgmr.msra.gmra.mxu0 %vm64_vm0, %v18_v16  ;;  %1818 = vmatmul.mubr.msk.f32.vlgmr.msra.gmra.mxu1 %vm64_vm0, %v18_v16 }
   0xb   :  { %394 = vmatprep.subr.mxu0 %v2102_v18  ;;  %159 = vmatprep.mubr.f32.mxu0 %v2518_v17 }
   0xc   :  { %395 = vmatpush1.msra.mxu0 %v2108_v19  ;;  %272 = vmatprep.mubr.f32.mxu1 %v2518_v17 }
   0xd   :  { %396 = vmatprep.subr.mxu0 %v2115_v20  ;;  %465 = vmatprep.subr.mxu1 %v2120_v21 }
   0xe   :  { %9 = vsyncpa [#allocation4], 0  ;;  %1811 = vmatmul.mubr.msk.f32.gmra.mxu0 %vm64_vm0, %v19_v22  ;;  %1819 = vmatmul.mubr.msk.f32.gmra.mxu1 %vm64_vm0, %v19_v22  ;;  %v2146_v25 = vld [vmem:[%s2515_s2 + $0x28] sm:$0xff]  ;;  %v2151_v26 = vld [vmem:[%s2515_s2 + $0x58] sm:$0xff]  ;;  %v44_v41 = vlaneseq }
   0xf   :  { %165 = vmatprep.mubr.f32.mxu0 %v2518_v17  ;;  %278 = vmatprep.mubr.f32.mxu1 %v2518_v17  ;;  %v20_v27 = vld [vmem:[%s2513_s0 + $0x10] sm:$0xff]  ;;  %v2164_v28 = vld [vmem:[%s2515_s2 + $0x20] sm:$0xff]  ;;  %v2177_v30 = vld [vmem:[%s2515_s2 + $0x8] sm:$0xff] }
  0x10   :  { %397 = vmatpush1.msra.mxu0 %v2133_v23  ;;  %466 = vmatpush1.msra.mxu1 %v2139_v24  ;;  %v2170_v29 = vld [vmem:[%s2515_s2 + $0x50] sm:$0xff]  ;;  %v2182_v31 = vld [vmem:[%s2515_s2 + $0x38] sm:$0xff]  ;;  %v2195_v33 = vld [vmem:[%s2515_s2] sm:$0xff]  ;;  %v45_v42 = vshrl.u32 %v44_v41, 7 }
  0x11   :  { %398 = vmatprep.subr.mxu0 %v2146_v25  ;;  %467 = vmatprep.subr.mxu1 %v2151_v26  ;;  %v21_v32 = vld [vmem:[%s2513_s0 + $0x18] sm:$0xff]  ;;  %v2201_v34 = vld [vmem:[%s2515_s2 + $0x30] sm:$0xff]  ;;  %v22_v36 = vld [vmem:[%s2513_s0 + $0x20] sm:$0xff] }
  0x12   :  { %1812 = vmatmul.mubr.msk.f32.gmra.mxu0 %vm64_vm0, %v20_v27  ;;  %1820 = vmatmul.mubr.msk.f32.gmra.mxu1 %vm64_vm0, %v20_v27  ;;  %v2208_v35 = vld [vmem:[%s2515_s2 + $0x18] sm:$0xff]  ;;  %v2221_v37 = vld [vmem:[%s2515_s2 + $0x10] sm:$0xff]  ;;  %v23_v38 = vld [vmem:[%s2513_s0 + $0x28] sm:$0xff]  ;;  %v46_v43 = vsub.s32 0, %v45_v42  ;;  %v54_v44 = vsub.s32 2, %v45_v42  ;;  %v50_v48 = vsub.s32 1, %v45_v42 }
  0x13   :  { %171 = vmatprep.mubr.f32.mxu0 %v2518_v17  ;;  %284 = vmatprep.mubr.f32.mxu1 %v2518_v17  ;;  %v24_v39 = vld [vmem:[%s2513_s0 + $0x30] sm:$0xff]  ;;  %v25_v40 = vld [vmem:[%s2513_s0 + $0x38] sm:$0xff]  ;;  %v42_v45 = vld [vmem:[%s2516_s3] sm:$0xf]  ;;  %v58_v49 = vsub.s32 3, %v45_v42  ;;  %s2019_s3 = smov [#allocation3]  }
  0x14   :  { %399 = vmatpush1.msra.mxu0 %v2164_v28  ;;  %468 = vmatpush1.msra.mxu1 %v2170_v29  ;;  %v47_v52 = vrot.slane %v42_v45, %v46_v43  ;;  %v2282_v53 = vrot.slane %v42_v45, %v54_v44  ;;  %v51_v56 = vrot.slane %v42_v45, %v50_v48  ;;  %s1799_s15 = sshll.u32 %s2019_s3, 4  ;;  %s1800_s15 = int_to_ptr.vmem [resolvable:$true] %s1799_s15 }
  0x15   :  { %400 = vmatprep.subr.mxu0 %v2177_v30  ;;  %469 = vmatprep.subr.mxu1 %v2182_v31  ;;  %v2284_v57 = vrot.slane %v42_v45, %v58_v49  ;;  %s1996_s16 = scalar_lea.vmem %s1800_s15, 1024  ;;  %p2001_p1 = scmp.lt.s32.totalorder %s1800_s15, %s1800_s15 }
  0x16   :  { %1813 = vmatmul.mubr.msk.f32.gmra.mxu0 %vm64_vm0, %v21_v32  ;;  %1821 = vmatmul.mubr.msk.f32.gmra.mxu1 %vm64_vm0, %v21_v32  ;;  %p1997_p0 = scmp.ne.s32.totalorder %s1800_s15, %s1996_s16  ;;  %p2002_p2 = scmp.lt.s32.totalorder %s1996_s16, %s1996_s16 }
  0x17   :  { %177 = vmatprep.mubr.f32.mxu0 %v2518_v17  ;;  %290 = vmatprep.mubr.f32.mxu1 %v2518_v17 }
  0x18   :  { %401 = vmatpush1.msra.mxu0 %v2195_v33  ;;  %470 = vmatpush1.msra.mxu1 %v2201_v34  ;;  %p2003_p3 = por %p2002_p2, %p2001_p1 }
  0x19   :  { %471 = vmatprep.subr.mxu1 %v2208_v35  ;;  %572 = vmatprep.subr.mxu0 %v2102_v18 }
  0x1a   :  { %1814 = vmatmul.mubr.msk.f32.gmra.mxu0 %vm64_vm0, %v22_v36  ;;  %1822 = vmatmul.mubr.msk.f32.gmra.mxu1 %vm64_vm0, %v22_v36  ;;  %p2004_p4 = pnand %p2003_p3, %p1997_p0 }
  0x1b   :  { %183 = vmatprep.mubr.f32.mxu0 %v2518_v17  ;;  %296 = vmatprep.mubr.f32.mxu1 %v2518_v17 }
  0x1c   :  { %472 = vmatpush1.msra.mxu1 %v2221_v37 }
  0x1d   :  { %643 = vmatprep.subr.mxu1 %v2120_v21 }
  0x1e   :  { %1815 = vmatmul.mubr.msk.f32.gmra.mxu0 %vm64_vm0, %v23_v38  ;;  %1823 = vmatmul.mubr.msk.f32.gmra.mxu1 %vm64_vm0, %v23_v38 }
  0x1f   :  { %189 = vmatprep.mubr.f32.mxu0 %v2518_v17  ;;  %302 = vmatprep.mubr.f32.mxu1 %v2518_v17 }
  0x22   :  { %1816 = vmatmul.mubr.msk.f32.gmra.mxu0 %vm64_vm0, %v24_v39  ;;  %1824 = vmatmul.mubr.msk.f32.gmra.mxu1 %vm64_vm0, %v24_v39 }
  0x23   :  { %195 = vmatprep.mubr.f32.mxu0 %v2518_v17  ;;  %308 = vmatprep.mubr.f32.mxu1 %v2518_v17 }
  0x26   :  { %1817 = vmatmul.mubr.msk.f32.gmra.mxu0 %vm64_vm0, %v25_v40  ;;  %1825 = vmatmul.mubr.msk.f32.gmra.mxu1 %vm64_vm0, %v25_v40 }
  0x27   :  { %434 = vmatprep.mubr.f32.mxu0 %v2518_v17  ;;  %505 = vmatprep.mubr.f32.mxu1 %v2518_v17 }
  0x2a   :  { %435 = vmatmul.mubr.f32.vlgmr.msra.gmra.mxu0 %v2518_v17  ;;  %506 = vmatmul.mubr.f32.vlgmr.msra.gmra.mxu1 %v2518_v17 }
  0x2b   :  { %573 = vmatpush1.msra.mxu0 %v2108_v19  ;;  %644 = vmatpush1.msra.mxu1 %v2139_v24 }
  0x2c   :  { %574 = vmatprep.subr.mxu0 %v2115_v20  ;;  %645 = vmatprep.subr.mxu1 %v2151_v26 }
  0x2d   :  { %575 = vmatpush1.msra.mxu0 %v2133_v23  ;;  %646 = vmatpush1.msra.mxu1 %v2170_v29 }
  0x2e   :  { %576 = vmatprep.subr.mxu0 %v2146_v25  ;;  %647 = vmatprep.subr.mxu1 %v2182_v31 }
  0x2f   :  { %577 = vmatpush1.msra.mxu0 %v2164_v28  ;;  %648 = vmatpush1.msra.mxu1 %v2201_v34 }
  0x30   :  { %578 = vmatprep.subr.mxu0 %v2177_v30  ;;  %649 = vmatprep.subr.mxu1 %v2208_v35 }
  0x31   :  { %579 = vmatpush1.msra.mxu0 %v2195_v33  ;;  %612 = vmatprep.mubr.f32.mxu0 %v2518_v17 }
  0x32   :  { %650 = vmatpush1.msra.mxu1 %v2221_v37  ;;  %683 = vmatprep.mubr.f32.mxu1 %v2518_v17 }
  0x33   :  { %751 = vmatprep.subr.mxu0 %v2102_v18  ;;  %822 = vmatprep.subr.mxu1 %v2120_v21 }
  0xca   :  { %v2274_v46 = vpop.f32.mrf.mxu0  ;;  %v2276_v47 = vpop.f32.mrf.mxu1 }
  0xcc   :  { %v2278_v50 = vpop.f32.mrf.mxu0  ;;  %v2280_v51 = vpop.f32.mrf.mxu1 }
  0xce   :  { %v161_v54 = vpop.f32.mrf.mxu0  ;;  %v274_v55 = vpop.f32.mrf.mxu1 }
  0xcf   :  { %v2286_v58 = vadd.f32 %v161_v54, %v47_v52  ;;  %v2289_v59 = vadd.f32 %v274_v55, %v2282_v53 }
  0xd0   :  { %v163_v60 = vpop.f32.mrf.mxu0  ;;  %v276_v61 = vpop.f32.mrf.mxu1 }
  0xd1   :  { %v2291_v62 = vadd.f32 %v163_v60, %v51_v56  ;;  %v2294_v63 = vadd.f32 %v276_v61, %v2284_v57 }
  0xd2   :  { %v167_v0 = vpop.f32.mrf.mxu0  ;;  %v280_v1 = vpop.f32.mrf.mxu1 }
  0xd3   :  { %v2296_v2 = vadd.f32 %v167_v0, %v47_v52  ;;  %v2299_v3 = vadd.f32 %v280_v1, %v2282_v53 }
  0xd4   :  { %v169_v4 = vpop.f32.mrf.mxu0  ;;  %v282_v5 = vpop.f32.mrf.mxu1 }
  0xd5   :  { %v2301_v6 = vadd.f32 %v169_v4, %v51_v56  ;;  %v2304_v7 = vadd.f32 %v282_v5, %v2284_v57 }
  0xd6   :  { %v173_v8 = vpop.f32.mrf.mxu0  ;;  %v286_v9 = vpop.f32.mrf.mxu1 }
  0xd7   :  { %v2306_v10 = vadd.f32 %v173_v8, %v47_v52  ;;  %v2309_v11 = vadd.f32 %v286_v9, %v2282_v53 }
  0xd8   :  { %v175_v12 = vpop.f32.mrf.mxu0  ;;  %v288_v13 = vpop.f32.mrf.mxu1 }
  0xd9   :  { %v2311_v14 = vadd.f32 %v175_v12, %v51_v56  ;;  %v2314_v15 = vadd.f32 %v288_v13, %v2284_v57 }
  0xda   :  { %v179_v16 = vpop.f32.mrf.mxu0  ;;  %v292_v22 = vpop.f32.mrf.mxu1 }
  0xdb   :  { %v2316_v27 = vadd.f32 %v179_v16, %v47_v52  ;;  %v2319_v32 = vadd.f32 %v292_v22, %v2282_v53 }
  0xdc   :  { %v181_v36 = vpop.f32.mrf.mxu0  ;;  %v294_v38 = vpop.f32.mrf.mxu1 }
  0xdd   :  { %v2321_v39 = vadd.f32 %v181_v36, %v51_v56  ;;  %v2324_v40 = vadd.f32 %v294_v38, %v2284_v57  ;;  %v156_v38 = vadd.f32 %v2274_v46, %v47_v52  ;;  %v271_v46 = vadd.f32 %v2280_v51, %v2284_v57 }
  0xde   :  { %v185_v41 = vpop.f32.mrf.mxu0  ;;  %v298_v42 = vpop.f32.mrf.mxu1 }
  0xdf   :  { %v2326_v43 = vadd.f32 %v185_v41, %v47_v52  ;;  %v2329_v44 = vadd.f32 %v298_v42, %v2282_v53 }
  0xe0   :  { %v187_v45 = vpop.f32.mrf.mxu0  ;;  %v300_v48 = vpop.f32.mrf.mxu1 }
  0xe1   :  { %v2331_v49 = vadd.f32 %v187_v45, %v51_v56  ;;  %v2334_v54 = vadd.f32 %v300_v48, %v2284_v57  ;;  %v158_v48 = vadd.f32 %v2278_v50, %v51_v56 }
  0xe2   :  { %v191_v55 = vpop.f32.mrf.mxu0  ;;  %v304_v60 = vpop.f32.mrf.mxu1 }
  0xe3   :  { %v2336_v61 = vadd.f32 %v191_v55, %v47_v52  ;;  %v2339_v0 = vadd.f32 %v304_v60, %v2282_v53 }
  0xe4   :  { %v193_v1 = vpop.f32.mrf.mxu0  ;;  %v306_v4 = vpop.f32.mrf.mxu1 }
  0xe5   :  { %v2341_v5 = vadd.f32 %v193_v1, %v51_v56  ;;  %v2344_v8 = vadd.f32 %v306_v4, %v2284_v57 }
  0xe6   :  { %v197_v9 = vpop.f32.mrf.mxu0  ;;  %v310_v12 = vpop.f32.mrf.mxu1 }
  0xe7   :  { %v2346_v13 = vadd.f32 %v197_v9, %v47_v52  ;;  %v2349_v16 = vadd.f32 %v310_v12, %v2282_v53 }
  0xe8   :  { %v199_v22 = vpop.f32.mrf.mxu0  ;;  %v312_v36 = vpop.f32.mrf.mxu1 }
  0xe9   :  { %2520 = vst [vmem:[#allocation6_spill] sm:$0xff] %v2349_v16  ;;  %v2352_v41 = vadd.f32 %v199_v22, %v51_v56  ;;  %v2355_v42 = vadd.f32 %v312_v36, %v2284_v57  ;;  %v269_v22 = vadd.f32 %v2276_v47, %v2282_v53 }
  0xea   :  { %v436_v45 = vpop.f32.mrf.mxu0  ;;  %v507_v9 = vpop.f32.mrf.mxu1 }
  0xeb   :  { %2521 = vst [vmem:[#allocation7_spill] sm:$0xff] %v2355_v42  ;;  %v512_v55 = vadd.f32 %v436_v45, %v156_v38  ;;  %v514_v42 = vadd.f32 %v507_v9, %v269_v22 }
  0xec   :  { %v438_v60 = vpop.f32.mrf.mxu0  ;;  %v509_v17 = vpop.f32.mrf.mxu1 }
  0xed   :  { %v1826_v1 = vmul.f32 -1.442695, %v512_v55  ;;  %v513_v4 = vadd.f32 %v438_v60, %v158_v48  ;;  %v515_v52 = vadd.f32 %v509_v17, %v271_v46 }
  0xef   :  { %1868 = vpow2.f32 %v1826_v1  ;;  %v1827_v12 = vmul.f32 -1.442695, %v513_v4  ;;  %v1828_v36 = vmul.f32 -1.442695, %v515_v52 }
  0xf1   :  { %1870 = vpow2.f32 %v1827_v12 }
  0xf2   :  { %1872 = vpow2.f32 %v1828_v36 }
  0xfc   :  { %v1869_v16 = vpop.eup %1868 }
  0xfd   :  { %v519_v50 = vadd.f32 1.0, %v1869_v16  ;;  %v2522_v16 = vmov 0.0  }
  0xfe   :  { %v1871_v56 = vpop.eup %1870 }
  0xff   :  { %1874 = vrcp.f32 %v519_v50  ;;  %v525_v38 = vadd.f32 1.0, %v1871_v56  ;;  %v1873_v45 = vpop.eup %1872 }
 0x100   :  { %1876 = vtanh.f32 %v514_v42  ;;  %v532_v1 = vadd.f32 1.0, %v1873_v45 }
 0x101   :  { %1878 = vrcp.f32 %v525_v38 }
 0x102   :  { %1880 = vrcp.f32 %v532_v1 }
 0x10c   :  { %v1875_v48 = vpop.eup %1874 }
 0x10d   :  { %v1877_v55 = vpop.eup %1876 }
 0x10e   :  { %v1879_v60 = vpop.eup %1878  ;;  %v536_v17 = vmul.f32 %v1877_v55, %v1875_v48 }
 0x10f   :  { %v535_v51 = vmul.f32 0.0, %v1879_v60  ;;  %v1881_v47 = vpop.eup %1880 }
 0x111   :  { %v537_v57 = vadd.f32 %v536_v17, %v535_v51 }
 0x113   :  { %1882 = vtanh.f32 %v537_v57 }
 0x120   :  { %v1883_v53 = vpop.eup %1882 }
 0x121   :  { %v539_v4 = vmul.f32 %v1883_v53, %v1881_v47 }
 0x123   :  { %540 = vst [vmem:[#allocation3] sm:$0xff] %v539_v4  ;;  %1829 = vmatmul.mubr.msk.f32.vlgmr.msra.gmra.mxu0 %vm64_vm0, %v539_v4  ;;  %1830 = vmatmul.mubr.msk.f32.vlgmr.msra.gmra.mxu1 %vm64_vm0, %v539_v4 }
 0x124   :  { %752 = vmatpush1.msra.mxu0 %v2108_v19  ;;  %823 = vmatpush1.msra.mxu1 %v2139_v24 }
 0x125   :  { %753 = vmatprep.subr.mxu0 %v2115_v20  ;;  %824 = vmatprep.subr.mxu1 %v2151_v26 }
 0x126   :  { %754 = vmatpush1.msra.mxu0 %v2133_v23  ;;  %825 = vmatpush1.msra.mxu1 %v2170_v29 }
 0x127   :  { %755 = vmatprep.subr.mxu0 %v2146_v25  ;;  %826 = vmatprep.subr.mxu1 %v2182_v31 }
 0x128   :  { %756 = vmatpush1.msra.mxu0 %v2164_v28  ;;  %827 = vmatpush1.msra.mxu1 %v2201_v34 }
 0x129   :  { %757 = vmatprep.subr.mxu0 %v2177_v30  ;;  %828 = vmatprep.subr.mxu1 %v2208_v35 }
 0x12a   :  { %758 = vmatpush1.msra.mxu0 %v2195_v33  ;;  %791 = vmatprep.mubr.f32.mxu0 %v2522_v16 }
 0x12b   :  { %829 = vmatpush1.msra.mxu1 %v2221_v37  ;;  %862 = vmatprep.mubr.f32.mxu1 %v2522_v16 }
 0x12c   :  { %930 = vmatprep.subr.mxu0 %v2102_v18  ;;  %1001 = vmatprep.subr.mxu1 %v2120_v21 }
 0x1e3   :  { %v614_v42 = vpop.f32.mrf.mxu0  ;;  %v685_v22 = vpop.f32.mrf.mxu1 }
 0x1e4   :  { %v690_v9 = vadd.f32 %v614_v42, %v2286_v58  ;;  %v692_v38 = vadd.f32 %v685_v22, %v2289_v59 }
 0x1e5   :  { %v616_v12 = vpop.f32.mrf.mxu0  ;;  %v687_v50 = vpop.f32.mrf.mxu1 }
 0x1e6   :  { %v1831_v46 = vmul.f32 -1.442695, %v690_v9  ;;  %v691_v52 = vadd.f32 %v616_v12, %v2291_v62  ;;  %v693_v56 = vadd.f32 %v687_v50, %v2294_v63 }
 0x1e8   :  { %1884 = vpow2.f32 %v1831_v46  ;;  %v1832_v36 = vmul.f32 -1.442695, %v691_v52  ;;  %v1833_v45 = vmul.f32 -1.442695, %v693_v56 }
 0x1ea   :  { %1886 = vpow2.f32 %v1832_v36 }
 0x1eb   :  { %1888 = vtanh.f32 %v692_v38 }
 0x1ec   :  { %1890 = vpow2.f32 %v1833_v45 }
 0x1f5   :  { %v1885_v48 = vpop.eup %1884 }
 0x1f6   :  { %v697_v55 = vadd.f32 1.0, %v1885_v48 }
 0x1f7   :  { %v1887_v60 = vpop.eup %1886 }
 0x1f8   :  { %1892 = vrcp.f32 %v697_v55  ;;  %v703_v58 = vadd.f32 1.0, %v1887_v60  ;;  %v1889_v1 = vpop.eup %1888 }
 0x1f9   :  { %v1891_v62 = vpop.eup %1890 }
 0x1fa   :  { %1894 = vrcp.f32 %v703_v58  ;;  %v710_v53 = vadd.f32 1.0, %v1891_v62 }
 0x1fc   :  { %1896 = vrcp.f32 %v710_v53 }
 0x205   :  { %v1893_v51 = vpop.eup %1892 }
 0x206   :  { %v714_v17 = vmul.f32 %v1893_v51, %v1889_v1 }
 0x207   :  { %v1895_v47 = vpop.eup %1894 }
 0x208   :  { %v713_v4 = vmul.f32 %v1895_v47, %v537_v57 }
 0x209   :  { %v1897_v59 = vpop.eup %1896 }
 0x20a   :  { %v715_v42 = vadd.f32 %v714_v17, %v713_v4 }
 0x20c   :  { %1898 = vtanh.f32 %v715_v42 }
 0x219   :  { %v1899_v63 = vpop.eup %1898 }
 0x21a   :  { %v717_v9 = vmul.f32 %v1899_v63, %v1897_v59 }
 0x21c   :  { %719 = vst [vmem:[#allocation3 + $0x8] sm:$0xff] %v717_v9  ;;  %1834 = vmatmul.mubr.msk.f32.vlgmr.msra.gmra.mxu0 %vm64_vm0, %v717_v9  ;;  %1835 = vmatmul.mubr.msk.f32.vlgmr.msra.gmra.mxu1 %vm64_vm0, %v717_v9 }
 0x21d   :  { %931 = vmatpush1.msra.mxu0 %v2108_v19  ;;  %1002 = vmatpush1.msra.mxu1 %v2139_v24 }
 0x21e   :  { %932 = vmatprep.subr.mxu0 %v2115_v20  ;;  %1003 = vmatprep.subr.mxu1 %v2151_v26 }
 0x21f   :  { %933 = vmatpush1.msra.mxu0 %v2133_v23  ;;  %1004 = vmatpush1.msra.mxu1 %v2170_v29 }
 0x220   :  { %934 = vmatprep.subr.mxu0 %v2146_v25  ;;  %1005 = vmatprep.subr.mxu1 %v2182_v31 }
 0x221   :  { %935 = vmatpush1.msra.mxu0 %v2164_v28  ;;  %1006 = vmatpush1.msra.mxu1 %v2201_v34 }
 0x222   :  { %936 = vmatprep.subr.mxu0 %v2177_v30  ;;  %1007 = vmatprep.subr.mxu1 %v2208_v35 }
 0x223   :  { %937 = vmatpush1.msra.mxu0 %v2195_v33  ;;  %970 = vmatprep.mubr.f32.mxu0 %v2522_v16 }
 0x224   :  { %1008 = vmatpush1.msra.mxu1 %v2221_v37  ;;  %1041 = vmatprep.mubr.f32.mxu1 %v2522_v16 }
 0x225   :  { %1109 = vmatprep.subr.mxu0 %v2102_v18  ;;  %1180 = vmatprep.subr.mxu1 %v2120_v21 }
 0x2dc   :  { %v793_v57 = vpop.f32.mrf.mxu0  ;;  %v864_v36 = vpop.f32.mrf.mxu1 }
 0x2dd   :  { %v869_v12 = vadd.f32 %v793_v57, %v2296_v2  ;;  %v871_v45 = vadd.f32 %v864_v36, %v2299_v3 }
 0x2de   :  { %v795_v46 = vpop.f32.mrf.mxu0  ;;  %v866_v56 = vpop.f32.mrf.mxu1 }
 0x2df   :  { %v1836_v52 = vmul.f32 -1.442695, %v869_v12  ;;  %v870_v22 = vadd.f32 %v795_v46, %v2301_v6  ;;  %v872_v38 = vadd.f32 %v866_v56, %v2304_v7 }
 0x2e1   :  { %1900 = vpow2.f32 %v1836_v52  ;;  %v1837_v50 = vmul.f32 -1.442695, %v870_v22  ;;  %v1838_v48 = vmul.f32 -1.442695, %v872_v38 }
 0x2e3   :  { %1902 = vpow2.f32 %v1837_v50 }
 0x2e4   :  { %1904 = vtanh.f32 %v871_v45 }
 0x2e5   :  { %1906 = vpow2.f32 %v1838_v48 }
 0x2ee   :  { %v1901_v55 = vpop.eup %1900 }
 0x2ef   :  { %v876_v60 = vadd.f32 1.0, %v1901_v55 }
 0x2f0   :  { %v1903_v58 = vpop.eup %1902 }
 0x2f1   :  { %1908 = vrcp.f32 %v876_v60  ;;  %v882_v2 = vadd.f32 1.0, %v1903_v58  ;;  %v1905_v1 = vpop.eup %1904 }
 0x2f2   :  { %v1907_v6 = vpop.eup %1906 }
 0x2f3   :  { %1910 = vrcp.f32 %v882_v2  ;;  %v889_v47 = vadd.f32 1.0, %v1907_v6 }
 0x2f5   :  { %1912 = vrcp.f32 %v889_v47 }
 0x2fe   :  { %v1909_v62 = vpop.eup %1908 }
 0x2ff   :  { %v893_v51 = vmul.f32 %v1909_v62, %v1905_v1 }
 0x300   :  { %v1911_v17 = vpop.eup %1910 }
 0x301   :  { %v892_v53 = vmul.f32 %v1911_v17, %v715_v42 }
 0x302   :  { %v1913_v3 = vpop.eup %1912 }
 0x303   :  { %v894_v4 = vadd.f32 %v893_v51, %v892_v53 }
 0x305   :  { %1914 = vtanh.f32 %v894_v4 }
 0x312   :  { %v1915_v7 = vpop.eup %1914 }
 0x313   :  { %v896_v59 = vmul.f32 %v1915_v7, %v1913_v3 }
 0x315   :  { %898 = vst [vmem:[#allocation3 + $0x10] sm:$0xff] %v896_v59  ;;  %1839 = vmatmul.mubr.msk.f32.vlgmr.msra.gmra.mxu0 %vm64_vm0, %v896_v59  ;;  %1840 = vmatmul.mubr.msk.f32.vlgmr.msra.gmra.mxu1 %vm64_vm0, %v896_v59 }
 0x316   :  { %1110 = vmatpush1.msra.mxu0 %v2108_v19  ;;  %1181 = vmatpush1.msra.mxu1 %v2139_v24 }
 0x317   :  { %1111 = vmatprep.subr.mxu0 %v2115_v20  ;;  %1182 = vmatprep.subr.mxu1 %v2151_v26 }
 0x318   :  { %1112 = vmatpush1.msra.mxu0 %v2133_v23  ;;  %1183 = vmatpush1.msra.mxu1 %v2170_v29 }
 0x319   :  { %1113 = vmatprep.subr.mxu0 %v2146_v25  ;;  %1184 = vmatprep.subr.mxu1 %v2182_v31 }
 0x31a   :  { %1114 = vmatpush1.msra.mxu0 %v2164_v28  ;;  %1185 = vmatpush1.msra.mxu1 %v2201_v34 }
 0x31b   :  { %1115 = vmatprep.subr.mxu0 %v2177_v30  ;;  %1186 = vmatprep.subr.mxu1 %v2208_v35 }
 0x31c   :  { %1116 = vmatpush1.msra.mxu0 %v2195_v33  ;;  %1149 = vmatprep.mubr.f32.mxu0 %v2522_v16 }
 0x31d   :  { %1187 = vmatpush1.msra.mxu1 %v2221_v37  ;;  %1220 = vmatprep.mubr.f32.mxu1 %v2522_v16 }
 0x31e   :  { %1288 = vmatprep.subr.mxu0 %v2102_v18  ;;  %1359 = vmatprep.subr.mxu1 %v2120_v21 }
 0x3d5   :  { %v972_v42 = vpop.f32.mrf.mxu0  ;;  %v1043_v46 = vpop.f32.mrf.mxu1 }
 0x3d6   :  { %v1048_v63 = vadd.f32 %v972_v42, %v2306_v10  ;;  %v1050_v50 = vadd.f32 %v1043_v46, %v2309_v11 }
 0x3d7   :  { %v974_v9 = vpop.f32.mrf.mxu0  ;;  %v1045_v22 = vpop.f32.mrf.mxu1 }
 0x3d8   :  { %v1841_v57 = vmul.f32 -1.442695, %v1048_v63  ;;  %v1049_v12 = vadd.f32 %v974_v9, %v2311_v14  ;;  %v1051_v36 = vadd.f32 %v1045_v22, %v2314_v15 }
 0x3da   :  { %1916 = vpow2.f32 %v1841_v57  ;;  %v1842_v52 = vmul.f32 -1.442695, %v1049_v12  ;;  %v1843_v56 = vmul.f32 -1.442695, %v1051_v36 }
 0x3dc   :  { %1918 = vpow2.f32 %v1842_v52 }
 0x3dd   :  { %1920 = vtanh.f32 %v1050_v50 }
 0x3de   :  { %1922 = vpow2.f32 %v1843_v56 }
 0x3e7   :  { %v1917_v38 = vpop.eup %1916 }
 0x3e8   :  { %v1055_v45 = vadd.f32 1.0, %v1917_v38 }
 0x3e9   :  { %v1919_v48 = vpop.eup %1918 }
 0x3ea   :  { %1924 = vrcp.f32 %v1055_v45  ;;  %v1061_v10 = vadd.f32 1.0, %v1919_v48  ;;  %v1921_v55 = vpop.eup %1920 }
 0x3eb   :  { %v1923_v14 = vpop.eup %1922 }
 0x3ec   :  { %1926 = vrcp.f32 %v1061_v10  ;;  %v1068_v1 = vadd.f32 1.0, %v1923_v14 }
 0x3ee   :  { %1928 = vrcp.f32 %v1068_v1 }
 0x3f7   :  { %v1925_v60 = vpop.eup %1924 }
 0x3f8   :  { %v1072_v58 = vmul.f32 %v1925_v60, %v1921_v55 }
 0x3f9   :  { %v1927_v2 = vpop.eup %1926 }
 0x3fa   :  { %v1071_v6 = vmul.f32 %v1927_v2, %v894_v4 }
 0x3fb   :  { %v1929_v11 = vpop.eup %1928 }
 0x3fc   :  { %v1073_v62 = vadd.f32 %v1072_v58, %v1071_v6 }
 0x3fe   :  { %1930 = vtanh.f32 %v1073_v62 }
 0x40b   :  { %v1931_v15 = vpop.eup %1930 }
 0x40c   :  { %v1075_v51 = vmul.f32 %v1931_v15, %v1929_v11 }
 0x40e   :  { %1077 = vst [vmem:[#allocation3 + $0x18] sm:$0xff] %v1075_v51  ;;  %1844 = vmatmul.mubr.msk.f32.vlgmr.msra.gmra.mxu0 %vm64_vm0, %v1075_v51  ;;  %1845 = vmatmul.mubr.msk.f32.vlgmr.msra.gmra.mxu1 %vm64_vm0, %v1075_v51 }
 0x40f   :  { %1289 = vmatpush1.msra.mxu0 %v2108_v19  ;;  %1360 = vmatpush1.msra.mxu1 %v2139_v24 }
 0x410   :  { %1290 = vmatprep.subr.mxu0 %v2115_v20  ;;  %1361 = vmatprep.subr.mxu1 %v2151_v26 }
 0x411   :  { %1291 = vmatpush1.msra.mxu0 %v2133_v23  ;;  %1362 = vmatpush1.msra.mxu1 %v2170_v29 }
 0x412   :  { %1292 = vmatprep.subr.mxu0 %v2146_v25  ;;  %1363 = vmatprep.subr.mxu1 %v2182_v31 }
 0x413   :  { %1293 = vmatpush1.msra.mxu0 %v2164_v28  ;;  %1364 = vmatpush1.msra.mxu1 %v2201_v34 }
 0x414   :  { %1294 = vmatprep.subr.mxu0 %v2177_v30  ;;  %1365 = vmatprep.subr.mxu1 %v2208_v35 }
 0x415   :  { %1295 = vmatpush1.msra.mxu0 %v2195_v33  ;;  %1328 = vmatprep.mubr.f32.mxu0 %v2522_v16 }
 0x416   :  { %1366 = vmatpush1.msra.mxu1 %v2221_v37  ;;  %1399 = vmatprep.mubr.f32.mxu1 %v2522_v16 }
 0x417   :  { %1467 = vmatprep.subr.mxu0 %v2102_v18  ;;  %1538 = vmatprep.subr.mxu1 %v2120_v21 }
 0x4ce   :  { %v1151_v17 = vpop.f32.mrf.mxu0  ;;  %v1222_v7 = vpop.f32.mrf.mxu1 }
 0x4cf   :  { %v1227_v47 = vadd.f32 %v1151_v17, %v2316_v27  ;;  %v1229_v9 = vadd.f32 %v1222_v7, %v2319_v32 }
 0x4d0   :  { %v1153_v53 = vpop.f32.mrf.mxu0  ;;  %v1224_v42 = vpop.f32.mrf.mxu1 }
 0x4d1   :  { %v1846_v4 = vmul.f32 -1.442695, %v1227_v47  ;;  %v1228_v3 = vadd.f32 %v1153_v53, %v2321_v39  ;;  %v1230_v63 = vadd.f32 %v1224_v42, %v2324_v40 }
 0x4d3   :  { %1932 = vpow2.f32 %v1846_v4  ;;  %v1847_v59 = vmul.f32 -1.442695, %v1228_v3  ;;  %v1848_v57 = vmul.f32 -1.442695, %v1230_v63 }
 0x4d5   :  { %1934 = vpow2.f32 %v1847_v59 }
 0x4d6   :  { %1936 = vtanh.f32 %v1229_v9 }
 0x4d7   :  { %1938 = vpow2.f32 %v1848_v57 }
 0x4e0   :  { %v1933_v12 = vpop.eup %1932 }
 0x4e1   :  { %v1234_v46 = vadd.f32 1.0, %v1933_v12 }
 0x4e2   :  { %v1935_v52 = vpop.eup %1934 }
 0x4e3   :  { %1940 = vrcp.f32 %v1234_v46  ;;  %v1240_v27 = vadd.f32 1.0, %v1935_v52  ;;  %v1937_v22 = vpop.eup %1936 }
 0x4e4   :  { %v1939_v39 = vpop.eup %1938 }
 0x4e5   :  { %1942 = vrcp.f32 %v1240_v27  ;;  %v1247_v38 = vadd.f32 1.0, %v1939_v39 }
 0x4e7   :  { %1944 = vrcp.f32 %v1247_v38 }
 0x4f0   :  { %v1941_v36 = vpop.eup %1940 }
 0x4f1   :  { %v1251_v50 = vmul.f32 %v1941_v36, %v1937_v22 }
 0x4f2   :  { %v1943_v56 = vpop.eup %1942 }
 0x4f3   :  { %v1250_v45 = vmul.f32 %v1943_v56, %v1073_v62 }
 0x4f4   :  { %v1945_v32 = vpop.eup %1944 }
 0x4f5   :  { %v1252_v48 = vadd.f32 %v1251_v50, %v1250_v45 }
 0x4f7   :  { %1946 = vtanh.f32 %v1252_v48 }
 0x504   :  { %v1947_v40 = vpop.eup %1946 }
 0x505   :  { %v1254_v10 = vmul.f32 %v1947_v40, %v1945_v32  ;;  %v2523_v40 = vld [vmem:[#allocation7_spill] sm:$0xff] }
 0x507   :  { %1256 = vst [vmem:[#allocation3 + $0x20] sm:$0xff] %v1254_v10  ;;  %1849 = vmatmul.mubr.msk.f32.vlgmr.msra.gmra.mxu0 %vm64_vm0, %v1254_v10  ;;  %1850 = vmatmul.mubr.msk.f32.vlgmr.msra.gmra.mxu1 %vm64_vm0, %v1254_v10 }
 0x508   :  { %1468 = vmatpush1.msra.mxu0 %v2108_v19  ;;  %1539 = vmatpush1.msra.mxu1 %v2139_v24 }
 0x509   :  { %1469 = vmatprep.subr.mxu0 %v2115_v20  ;;  %1540 = vmatprep.subr.mxu1 %v2151_v26 }
 0x50a   :  { %1470 = vmatpush1.msra.mxu0 %v2133_v23  ;;  %1541 = vmatpush1.msra.mxu1 %v2170_v29 }
 0x50b   :  { %1471 = vmatprep.subr.mxu0 %v2146_v25  ;;  %1542 = vmatprep.subr.mxu1 %v2182_v31 }
 0x50c   :  { %1472 = vmatpush1.msra.mxu0 %v2164_v28  ;;  %1543 = vmatpush1.msra.mxu1 %v2201_v34 }
 0x50d   :  { %1473 = vmatprep.subr.mxu0 %v2177_v30  ;;  %1544 = vmatprep.subr.mxu1 %v2208_v35 }
 0x50e   :  { %1474 = vmatpush1.msra.mxu0 %v2195_v33  ;;  %1507 = vmatprep.mubr.f32.mxu0 %v2522_v16 }
 0x50f   :  { %1545 = vmatpush1.msra.mxu1 %v2221_v37  ;;  %1578 = vmatprep.mubr.f32.mxu1 %v2522_v16 }
 0x510   :  { %1646 = vmatprep.subr.mxu0 %v2102_v18  ;;  %1717 = vmatprep.subr.mxu1 %v2120_v21 }
 0x5c7   :  { %v1330_v55 = vpop.f32.mrf.mxu0  ;;  %v1401_v1 = vpop.f32.mrf.mxu1 }
 0x5c8   :  { %v1406_v14 = vadd.f32 %v1330_v55, %v2326_v43  ;;  %v1408_v15 = vadd.f32 %v1401_v1, %v2329_v44  ;;  %v2524_v55 = vld [vmem:[#allocation6_spill] sm:$0xff] }
 0x5c9   :  { %v1332_v60 = vpop.f32.mrf.mxu0  ;;  %v1403_v62 = vpop.f32.mrf.mxu1 }
 0x5ca   :  { %v1851_v58 = vmul.f32 -1.442695, %v1406_v14  ;;  %v1407_v2 = vadd.f32 %v1332_v60, %v2331_v49  ;;  %v1409_v11 = vadd.f32 %v1403_v62, %v2334_v54 }
 0x5cc   :  { %1948 = vpow2.f32 %v1851_v58  ;;  %v1852_v6 = vmul.f32 -1.442695, %v1407_v2  ;;  %v1853_v51 = vmul.f32 -1.442695, %v1409_v11 }
 0x5ce   :  { %1950 = vpow2.f32 %v1852_v6 }
 0x5cf   :  { %1952 = vtanh.f32 %v1408_v15 }
 0x5d0   :  { %1954 = vpow2.f32 %v1853_v51 }
 0x5d9   :  { %v1949_v18 = vpop.eup %1948 }
 0x5da   :  { %v1413_v17 = vadd.f32 1.0, %v1949_v18 }
 0x5db   :  { %v1951_v21 = vpop.eup %1950 }
 0x5dc   :  { %1956 = vrcp.f32 %v1413_v17  ;;  %v1419_v43 = vadd.f32 1.0, %v1951_v21  ;;  %v1953_v47 = vpop.eup %1952 }
 0x5dd   :  { %v1955_v49 = vpop.eup %1954 }
 0x5de   :  { %1958 = vrcp.f32 %v1419_v43  ;;  %v1426_v7 = vadd.f32 1.0, %v1955_v49 }
 0x5e0   :  { %1960 = vrcp.f32 %v1426_v7 }
 0x5e9   :  { %v1957_v53 = vpop.eup %1956 }
 0x5ea   :  { %v1430_v4 = vmul.f32 %v1957_v53, %v1953_v47 }
 0x5eb   :  { %v1959_v3 = vpop.eup %1958 }
 0x5ec   :  { %v1429_v59 = vmul.f32 %v1959_v3, %v1252_v48 }
 0x5ed   :  { %v1961_v44 = vpop.eup %1960 }
 0x5ee   :  { %v1431_v42 = vadd.f32 %v1430_v4, %v1429_v59 }
 0x5f0   :  { %1962 = vtanh.f32 %v1431_v42 }
 0x5fd   :  { %v1963_v54 = vpop.eup %1962 }
 0x5fe   :  { %v1433_v63 = vmul.f32 %v1963_v54, %v1961_v44 }
 0x600   :  { %1435 = vst [vmem:[#allocation3 + $0x28] sm:$0xff] %v1433_v63  ;;  %1854 = vmatmul.mubr.msk.f32.vlgmr.msra.gmra.mxu0 %vm64_vm0, %v1433_v63  ;;  %1855 = vmatmul.mubr.msk.f32.vlgmr.msra.gmra.mxu1 %vm64_vm0, %v1433_v63 }
 0x601   :  { %1647 = vmatpush1.msra.mxu0 %v2108_v19  ;;  %1718 = vmatpush1.msra.mxu1 %v2139_v24 }
 0x602   :  { %1648 = vmatprep.subr.mxu0 %v2115_v20  ;;  %1719 = vmatprep.subr.mxu1 %v2151_v26 }
 0x603   :  { %1649 = vmatpush1.msra.mxu0 %v2133_v23  ;;  %1720 = vmatpush1.msra.mxu1 %v2170_v29 }
 0x604   :  { %1650 = vmatprep.subr.mxu0 %v2146_v25  ;;  %1721 = vmatprep.subr.mxu1 %v2182_v31 }
 0x605   :  { %1651 = vmatpush1.msra.mxu0 %v2164_v28  ;;  %1722 = vmatpush1.msra.mxu1 %v2201_v34 }
 0x606   :  { %1652 = vmatprep.subr.mxu0 %v2177_v30  ;;  %1723 = vmatprep.subr.mxu1 %v2208_v35 }
 0x607   :  { %1653 = vmatpush1.msra.mxu0 %v2195_v33  ;;  %1686 = vmatprep.mubr.f32.mxu0 %v2522_v16 }
 0x608   :  { %1724 = vmatpush1.msra.mxu1 %v2221_v37  ;;  %1757 = vmatprep.mubr.f32.mxu1 %v2522_v16 }
 0x6c0   :  { %v1509_v19 = vpop.f32.mrf.mxu0  ;;  %v1580_v26 = vpop.f32.mrf.mxu1 }
 0x6c1   :  { %v1585_v20 = vadd.f32 %v1509_v19, %v2336_v61  ;;  %v1587_v31 = vadd.f32 %v1580_v26, %v2339_v0 }
 0x6c2   :  { %v1511_v23 = vpop.f32.mrf.mxu0  ;;  %v1582_v29 = vpop.f32.mrf.mxu1 }
 0x6c3   :  { %v1856_v24 = vmul.f32 -1.442695, %v1585_v20  ;;  %v1586_v25 = vadd.f32 %v1511_v23, %v2341_v5  ;;  %v1588_v30 = vadd.f32 %v1582_v29, %v2344_v8 }
 0x6c5   :  { %1964 = vpow2.f32 %v1856_v24  ;;  %v1857_v28 = vmul.f32 -1.442695, %v1586_v25  ;;  %v1858_v33 = vmul.f32 -1.442695, %v1588_v30 }
 0x6c7   :  { %1966 = vpow2.f32 %v1857_v28 }
 0x6c8   :  { %1968 = vtanh.f32 %v1587_v31 }
 0x6c9   :  { %1970 = vpow2.f32 %v1858_v33 }
 0x6d2   :  { %v1965_v34 = vpop.eup %1964 }
 0x6d3   :  { %v1592_v35 = vadd.f32 1.0, %v1965_v34 }
 0x6d4   :  { %v1967_v37 = vpop.eup %1966 }
 0x6d5   :  { %1972 = vrcp.f32 %v1592_v35  ;;  %v1598_v61 = vadd.f32 1.0, %v1967_v37  ;;  %v1969_v16 = vpop.eup %1968 }
 0x6d6   :  { %v1971_v5 = vpop.eup %1970 }
 0x6d7   :  { %1974 = vrcp.f32 %v1598_v61  ;;  %v1605_v46 = vadd.f32 1.0, %v1971_v5 }
 0x6d9   :  { %1976 = vrcp.f32 %v1605_v46 }
 0x6e2   :  { %v1973_v9 = vpop.eup %1972 }
 0x6e3   :  { %v1609_v57 = vmul.f32 %v1973_v9, %v1969_v16 }
 0x6e4   :  { %v1975_v12 = vpop.eup %1974 }
 0x6e5   :  { %v1608_v52 = vmul.f32 %v1975_v12, %v1431_v42 }
 0x6e6   :  { %v1977_v0 = vpop.eup %1976 }
 0x6e7   :  { %v1610_v27 = vadd.f32 %v1609_v57, %v1608_v52 }
 0x6e9   :  { %1978 = vtanh.f32 %v1610_v27 }
 0x6f6   :  { %v1979_v8 = vpop.eup %1978 }
 0x6f7   :  { %v1612_v22 = vmul.f32 %v1979_v8, %v1977_v0 }
 0x6f9   :  { %1614 = vst [vmem:[#allocation3 + $0x30] sm:$0xff] %v1612_v22  ;;  %1859 = vmatmul.mubr.msk.f32.vlgmr.msra.gmra.mxu0 %vm64_vm0, %v1612_v22  ;;  %1860 = vmatmul.mubr.msk.f32.vlgmr.msra.gmra.mxu1 %vm64_vm0, %v1612_v22 }
 0x7b9   :  { %v1688_v39 = vpop.f32.mrf.mxu0  ;;  %v1759_v45 = vpop.f32.mrf.mxu1 }
 0x7ba   :  { %v1764_v36 = vadd.f32 %v1688_v39, %v2346_v13  ;;  %v1766_v14 = vadd.f32 %v1759_v45, %v2524_v55 }
 0x7bb   :  { %v1690_v50 = vpop.f32.mrf.mxu0  ;;  %v1761_v32 = vpop.f32.mrf.mxu1 }
 0x7bc   :  { %v1861_v56 = vmul.f32 -1.442695, %v1764_v36  ;;  %v1765_v38 = vadd.f32 %v1690_v50, %v2352_v41  ;;  %v1767_v10 = vadd.f32 %v1761_v32, %v2523_v40 }
 0x7be   :  { %1980 = vpow2.f32 %v1861_v56  ;;  %v1862_v48 = vmul.f32 -1.442695, %v1765_v38  ;;  %v1863_v60 = vmul.f32 -1.442695, %v1767_v10 }
 0x7c0   :  { %1982 = vpow2.f32 %v1862_v48 }
 0x7c1   :  { %1984 = vtanh.f32 %v1766_v14 }
 0x7c2   :  { %1986 = vpow2.f32 %v1863_v60 }
 0x7cb   :  { %v1981_v58 = vpop.eup %1980 }
 0x7cc   :  { %v1771_v2 = vadd.f32 1.0, %v1981_v58 }
 0x7cd   :  { %v1983_v1 = vpop.eup %1982 }
 0x7ce   :  { %1988 = vrcp.f32 %v1771_v2  ;;  %v1777_v13 = vadd.f32 1.0, %v1983_v1  ;;  %v1985_v6 = vpop.eup %1984 }
 0x7cf   :  { %v1987_v41 = vpop.eup %1986 }
 0x7d0   :  { %1990 = vrcp.f32 %v1777_v13  ;;  %v1784_v51 = vadd.f32 1.0, %v1987_v41 }
 0x7d2   :  { %1992 = vrcp.f32 %v1784_v51 }
 0x7db   :  { %v1989_v62 = vpop.eup %1988 }
 0x7dc   :  { %v1788_v11 = vmul.f32 %v1989_v62, %v1985_v6 }
 0x7dd   :  { %v1991_v15 = vpop.eup %1990 }
 0x7de   :  { %v1787_v18 = vmul.f32 %v1991_v15, %v1610_v27 }
 0x7df   :  { %v1993_v21 = vpop.eup %1992 }
 0x7e0   :  { %v1789_v17 = vadd.f32 %v1788_v11, %v1787_v18 }
 0x7e2   :  { %1994 = vtanh.f32 %v1789_v17 }
 0x7ef   :  { %v1995_v43 = vpop.eup %1994 }
 0x7f0   :  { %v1791_v47 = vmul.f32 %v1995_v43, %v1993_v21 }
 0x7f2   :  { %1793 = vst [vmem:[#allocation3 + $0x38] sm:$0xff] %v1791_v47 }
 0x7f3   :  { %2007 = shalt.err (!%p2004_p4)
}
 0x7f4   :  { %s2020_s17 = smov 128   ;;  %s2021_s18 = smov 8  }
 0x7f5   :  { %1805 = dma.vmem_to_hbm [thread:$0]  %s1800_s15, 1024, %s2517_s4, [#allocation4], %s2020_s17, %s2020_s17, %s2021_s18  }
 0x7f6   :  { %2016 = dma.done.wait [#allocation4], 1024  }
 0x7f7   :  { %2017 = vsyncadd [#allocation4], 4294966272 }
 0x7f8   :  { %1809 = vsyncpa [#allocation4], 1 }

</bundles_post_ra>
